<compile_context>
chip_gen: v5e
topology: v5e:2x2
jax: 0.10.0
libtpu: 0.0.40
codegen_flags: <defaults>
</compile_context>

<pallas_src>
import jax
import jax.numpy as jnp
from jax.experimental import pallas as pl
from jax.experimental.pallas import tpu as pltpu


def _round_up(x, m):
    return ((x + m - 1) // m) * m


def matvec_kernel(x_ref, w_ref, o_ref):
    # x_ref: (TILE_N, d), w_ref: (1, d), o_ref: (TILE_N, 1)
    # Memory-bound mat-vec: VPU multiply (w broadcast over sublanes) followed
    # by a lane reduction.  No MXU (a width-1 matmul wastes ~255/256 of the
    # MXU) and no in-kernel transpose/relayout.
    prod = x_ref[...] * w_ref[...]                       # (TILE_N, d)
    o_ref[...] = jnp.sum(prod, axis=-1, keepdims=True).astype(o_ref.dtype)


def linear_model_forward(x, w, *, x_tile_budget_bytes=16 * 1024 * 1024):
    """Pallas equivalent of LinearModel.forward: out = x @ w (w is (d,))."""
    n, d = x.shape
    assert w.shape == (d,)

    # --- Choose TILE_N: as large as possible (better pipelining, fewer grid
    # steps) but capped so two in-flight x buffers stay well inside VMEM on
    # every TPU generation (v7x has only 64 MiB / 32 MiB scoped default).
    bytes_per_row = d * x.dtype.itemsize
    max_rows = max(8, x_tile_budget_bytes // (2 * bytes_per_row))
    tile_n = min(1024, max_rows, _round_up(n, 8))
    tile_n = max(8, (tile_n // 8) * 8)                   # f32 sublane multiple

    n_pad = _round_up(n, tile_n)
    if n_pad != n:
        # Zero padding rows contribute zero products and are sliced off below.
        x = jnp.pad(x, ((0, n_pad - n), (0, 0)))
    num_tiles = n_pad // tile_n

    w2 = w.reshape(1, d)

    # Explicit, modest VMEM request: 2 double-buffered x tiles + w + out + slack.
    x_tile_bytes = tile_n * bytes_per_row
    vmem_limit = int(min(48 * 1024 * 1024, max(4 * 1024 * 1024, 4 * x_tile_bytes)))

    out = pl.pallas_call(
        matvec_kernel,
        out_shape=jax.ShapeDtypeStruct((n_pad, 1), x.dtype),
        grid=(num_tiles,),
        in_specs=[
            pl.BlockSpec((tile_n, d), lambda i: (i, 0)),  # stream x by batch tile
            pl.BlockSpec((1, d), lambda i: (0, 0)),       # w resident every step
        ],
        out_specs=pl.BlockSpec((tile_n, 1), lambda i: (i, 0)),
        compiler_params=pltpu.CompilerParams(
            # Batch tiles are independent -> megacore-shard on v7x (2 TCs);
            # harmless on single-core v5e/v6e.
            dimension_semantics=("parallel",),
            vmem_limit_bytes=vmem_limit,
        ),
    )(x, w2)
    return out[:n, 0]


if __name__ == "__main__":
    # NOTE: at toy sizes like this, plain XLA `x @ w` beats any Pallas kernel
    # (per-step + custom-call overhead dwarfs ~1 KiB of data movement); the
    # kernel above is structured so it scales to large N*d where it matters.
    N, d = 8, 32

    key = jax.random.PRNGKey(0)
    x = jax.random.normal(key, (N, d), dtype=jnp.float32)

    # Deterministic parameter init, mirroring torch.ones([args.d])
    w = jnp.ones((d,), dtype=jnp.float32)

    out = linear_model_forward(x, w)
    out = jax.block_until_ready(out)

    # Sanity-check against plain JAX reference
    ref = x @ w
    assert out.shape == (N,)
    assert jnp.allclose(out, ref, atol=1e-5, rtol=1e-5)

    print("KERNEL_OK")
</pallas_src>

<mosaic_0001>
module attributes {stable_mosaic.version = 11 : i64} {
  func.func @matvec_kernel(%arg0: i32, %arg1: memref<8x32xf32, #tpu.memory_space<vmem>>, %arg2: memref<1x32xf32, #tpu.memory_space<vmem>>, %arg3: memref<8x1xf32, #tpu.memory_space<vmem>>) attributes {dimension_semantics = [#tpu.dimension_semantics<parallel>], iteration_bounds = array<i64: 1>, scalar_prefetch = 0 : i64, scratch_operands = 0 : i64, tpu.core_type = #tpu.core_type<tc>, window_params = [{transform_indices = @transform_0, window_bounds = array<i64: 8, 32>}, {pipeline_mode = #tpu.pipeline_mode<synchronous>, transform_indices = @transform_1, window_bounds = array<i64: 1, 32>}, {transform_indices = @transform_2, window_bounds = array<i64: 8, 1>}]} {
    %c0 = arith.constant 0 : index
    %c0_0 = arith.constant 0 : index
    %0 = vector.load %arg1[%c0, %c0_0] : memref<8x32xf32, #tpu.memory_space<vmem>>, vector<8x32xf32>
    %c0_1 = arith.constant 0 : index
    %c0_2 = arith.constant 0 : index
    %1 = vector.load %arg2[%c0_1, %c0_2] : memref<1x32xf32, #tpu.memory_space<vmem>>, vector<1x32xf32>
    %2 = vector.broadcast %1 : vector<1x32xf32> to vector<8x32xf32>
    %3 = arith.mulf %0, %2 : vector<8x32xf32>
    %cst = arith.constant dense<0.000000e+00> : vector<8xf32>
    %4 = vector.multi_reduction <add>, %3, %cst [1] : vector<8x32xf32> to vector<8xf32>
    %5 = vector.shape_cast %4 : vector<8xf32> to vector<8x1xf32>
    %c0_3 = arith.constant 0 : index
    %c0_4 = arith.constant 0 : index
    %6 = vector.load %arg3[%c0_3, %c0_4] : memref<8x1xf32, #tpu.memory_space<vmem>>, vector<8x1xf32>
    tpu.vector_store %arg3[%c0_3, %c0_4], %5 {strides = array<i32>} : memref<8x1xf32, #tpu.memory_space<vmem>>, vector<8x1xf32>,
    return
  }
  func.func @transform_0(%arg0: i32) -> (i32, i32) {
    %c0_i32 = arith.constant 0 : i32
    %c0_i32_0 = arith.constant 0 : i32
    return %arg0, %c0_i32 : i32, i32
  }
  func.func @transform_1(%arg0: i32) -> (i32, i32) {
    %c0_i32 = arith.constant 0 : i32
    %c0_i32_0 = arith.constant 0 : i32
    %c0_i32_1 = arith.constant 0 : i32
    return %c0_i32, %c0_i32_0 : i32, i32
  }
  func.func @transform_2(%arg0: i32) -> (i32, i32) {
    %c0_i32 = arith.constant 0 : i32
    %c0_i32_0 = arith.constant 0 : i32
    return %arg0, %c0_i32 : i32, i32
  }
}

</mosaic_0001>

<bundles_post_ra>
// kernel: tpu_custom_call.1
= control target key start
LH: loop header
LB: loop body
LE: loop exit
PB: predicated region body
PF: predicated region fallthrough
CT: control target
= control target key end

     0   :  { %7 = vsyncpa [#allocation3], 0  ;;  %s138_s0 = inlined_call_operand.hbm [shape: f32[8,32], index: 0, kind: input, shape index: {}]   ;;  %s139_s1 = inlined_call_operand.hbm [shape: f32[1,32], index: 1, kind: input, shape index: {}]   ;;  %s140_s2 = inlined_call_operand.vmem [shape: f32[8,1], index: 2, kind: output, shape index: {}]  }
   0x1   :  { %s14_s11 = sshll.u32 %s138_s0, 4  ;;  %s15_s11 = int_to_ptr.hbm [resolvable:$true] %s14_s11 }
   0x2   :  { %8 = vsyncpa [#allocation5], 0  ;;  %s112_s12 = smov [#allocation2]   ;;  %s25_s16 = sshll.u32 %s139_s1, 4  ;;  %s26_s16 = int_to_ptr.hbm [resolvable:$true] %s25_s16 }
   0x3   :  { %s16_s13 = sshll.u32 %s112_s12, 4  ;;  %s113_s17 = smov [#allocation4]   ;;  %s17_s13 = int_to_ptr.vmem [resolvable:$true] %s16_s13 }
   0x4   :  { %19 = dma.hbm_to_vmem [thread:$0]  %s15_s11, 128, %s17_s13, [#allocation3]  }
   0x5   :  { %s27_s18 = sshll.u32 %s113_s17, 4  ;;  %s28_s18 = int_to_ptr.vmem [resolvable:$true] %s27_s18 }
   0x6   :  { %30 = dma.hbm_to_vmem [thread:$0]  %s26_s16, 16, %s28_s18, [#allocation5]  }
   0x7   :  { %108 = dma.done.wait [#allocation3], 128  }
   0x8   :  { %109 = vsyncadd [#allocation3], 4294967168 }
   0x9   :  { %110 = dma.done.wait [#allocation5], 16  }
   0xa   :  { %111 = vsyncadd [#allocation5], 4294967280  ;;  %v39_v0 = vld [vmem:[#allocation2] sm:$0xff]  ;;  %v59_v1 = vld [vmem:[#allocation4] ss:$0 sm:$0xff]  ;;  %vm45_vm0 = vcmask 261120  }
   0xb   :  { %v44_v2 = vmul.f32 %v59_v1, %v39_v0  ;;  %vm49_vm1 = vcmask 7168  }
   0xd   :  { %v46_v3 = vsel %vm45_vm0, %v44_v2, 0.0 }
   0xe   :  { %47 = vadd.xlane.f32.xlu0 %v46_v3 }
  0x81   :  { %v48_v4 = vpop.xlane.xlu0 %47 }
  0x82   :  { %50 = vst.msk [vmem:[%s140_s2] sm:$0xff] %vm49_vm1, %v48_v4 }
  0x83   :  { %55 = vsyncpa [#allocation3], 1 }
  0x84   :  { %56 = vsyncpa [#allocation5], 1 }

</bundles_post_ra>
